<compile_context>
chip_gen: v6e
topology: v6e:2x2x1
jax: 0.10.0
libtpu: 0.0.40
codegen_flags: <defaults>
</compile_context>

<pallas_src>
import math

import jax
import jax.numpy as jnp
import numpy as np
from jax import lax
from jax.experimental import pallas as pl
from jax.experimental.pallas import tpu as pltpu

_MIB = 1024 * 1024


def _vmem_capacity_bytes():
    try:
        info = pltpu.get_tpu_info()
        for name in ("vmem_capacity_bytes", "vmem_bytes", "vmem_size_bytes"):
            v = getattr(info, name, None)
            if v:
                return int(v)
    except Exception:
        pass
    return 64 * _MIB  # conservative fallback (v7x per-TensorCore)


_VMEM_CAP = _vmem_capacity_bytes()
# ~100 MiB scoped on 128 MiB chips (v5e/v6e), ~40 MiB on v7x's 64 MiB.
_VMEM_LIMIT = int(min(max(_VMEM_CAP - 24 * _MIB, (_VMEM_CAP * 3) // 5), 100 * _MIB))


# ---------------------------------------------------------------------------
# Linear projection kernel: y = x @ W + b   (W stored pre-transposed (Din, Dout))
# ---------------------------------------------------------------------------
def _linear_kernel(x_ref, w_ref, b_ref, o_ref):
    # x_ref: (Rt, Din)  w_ref: (Din, Ct) bf16  b_ref: (1, Ct)  o_ref: (Rt, Ct)
    y = jnp.dot(x_ref[...].astype(jnp.bfloat16), w_ref[...],
                preferred_element_type=jnp.float32)
    o_ref[...] = (y + b_ref[...].astype(jnp.float32)).astype(o_ref.dtype)


def pallas_linear(x, w_t, b, *, out_dtype=None, row_tile=None, col_tile=512):
    """x: (B, S, Din); w_t: (Din, Dout) pre-transposed; b: (Dout,) -> (B, S, Dout)."""
    B, S, Din = x.shape
    Dout = w_t.shape[1]
    R = B * S
    out_dtype = out_dtype if out_dtype is not None else x.dtype

    if row_tile is None:
        row_tile = 1024 if _VMEM_LIMIT >= 80 * _MIB else 512
    rt = min(R, row_tile)
    ct = min(Dout, col_tile)

    x2 = x.reshape(R, Din)                      # tile over rows, not batch
    w_bf = w_t.astype(jnp.bfloat16)             # halve weight HBM traffic

    out = pl.pallas_call(
        _linear_kernel,
        out_shape=jax.ShapeDtypeStruct((R, Dout), out_dtype),
        grid=(pl.cdiv(R, rt), pl.cdiv(Dout, ct)),
        in_specs=[
            pl.BlockSpec((rt, Din), lambda i, j: (i, 0)),
            pl.BlockSpec((Din, ct), lambda i, j: (0, j)),
            pl.BlockSpec((1, ct), lambda i, j: (0, j)),
        ],
        out_specs=pl.BlockSpec((rt, ct), lambda i, j: (i, j)),
        compiler_params=pltpu.CompilerParams(
            dimension_semantics=("parallel", "parallel"),
            vmem_limit_bytes=_VMEM_LIMIT,
        ),
    )(x2, w_bf, b.reshape(1, Dout))
    return out.reshape(B, S, Dout)


# ---------------------------------------------------------------------------
# Relative attention kernel (one (batch*head) slice per grid step)
# ---------------------------------------------------------------------------
def _make_rel_attn_kernel(sq, sk, num_buckets, max_pos):
    contract_last = (((1,), (1,)), ((), ()))   # contract last dim of both operands

    def kernel(q_ref, k_ref, v_ref, tk_ref, tv_ref, o_ref, attn_ref, w_scr):
        q = q_ref[0]                                   # (Sq, D) bf16 (scale folded in)
        k = k_ref[0]                                   # (Sk, D) bf16
        v = v_ref[0]                                   # (Sk, D) bf16

        # content scores on the MXU, no transposed operand materialized
        scores = lax.dot_general(q, k, contract_last,
                                 preferred_element_type=jnp.float32)      # (Sq, Sk)
        # relative scores: small MXU matmul against the (2P+1, D) table ...
        r = lax.dot_general(q, tk_ref[...], contract_last,
                            preferred_element_type=jnp.float32)           # (Sq, 2P+1)

        # ... then exact Toeplitz banded expansion (no 3-D one-hot):
        rows = lax.broadcasted_iota(jnp.int32, (sq, sk), 0)
        cols = lax.broadcasted_iota(jnp.int32, (sq, sk), 1)
        dc = jnp.clip(cols - rows, -max_pos, max_pos) + max_pos           # (Sq, Sk)
        for b in range(num_buckets):                   # static, small (2P+1)
            scores = scores + jnp.where(dc == b, r[:, b:b + 1], 0.0)

        # softmax statistics in f32; exact reciprocal (attn is a module output)
        scores = scores - jnp.max(scores, axis=-1, keepdims=True)
        e = jnp.exp(scores)
        attn = e * pl.reciprocal(jnp.sum(e, axis=-1, keepdims=True), approx=False)
        attn_ref[0] = attn.astype(attn_ref.dtype)

        # content output on the MXU
        out = jnp.dot(attn.astype(jnp.bfloat16), v,
                      preferred_element_type=jnp.float32)                 # (Sq, D)

        # relative output: per-bucket banded aggregation of attn -> (Sq, 2P+1),
        # then one MXU matmul with the value table.
        for b in range(num_buckets):
            w_scr[:, b:b + 1] = jnp.sum(jnp.where(dc == b, attn, 0.0),
                                        axis=1, keepdims=True)
        out = out + jnp.dot(w_scr[...].astype(jnp.bfloat16), tv_ref[...],
                            preferred_element_type=jnp.float32)           # (Sq, D)
        o_ref[0] = out.astype(o_ref.dtype)

    return kernel


def pallas_relative_attention(q, k, v, rel_k_table, rel_v_table, max_pos,
                              *, out_dtype=None, attn_dtype=jnp.float32):
    """q/k/v: (BH, S, D) with 1/scale folded into q; tables: (2*max_pos+1, D).

    Returns (out (BH, Sq, D), attn (BH, Sq, Sk)).
    """
    BH, Sq, D = q.shape
    Sk = k.shape[1]
    NB = rel_k_table.shape[0]
    out_dtype = out_dtype if out_dtype is not None else q.dtype

    kernel = _make_rel_attn_kernel(Sq, Sk, NB, max_pos)
    return pl.pallas_call(
        kernel,
        out_shape=(
            jax.ShapeDtypeStruct((BH, Sq, D), out_dtype),
            jax.ShapeDtypeStruct((BH, Sq, Sk), attn_dtype),
        ),
        grid=(BH,),
        in_specs=[
            pl.BlockSpec((1, Sq, D), lambda b: (b, 0, 0)),
            pl.BlockSpec((1, Sk, D), lambda b: (b, 0, 0)),
            pl.BlockSpec((1, Sk, D), lambda b: (b, 0, 0)),
            pl.BlockSpec((NB, D), lambda b: (0, 0)),
            pl.BlockSpec((NB, D), lambda b: (0, 0)),
        ],
        out_specs=(
            pl.BlockSpec((1, Sq, D), lambda b: (b, 0, 0)),
            pl.BlockSpec((1, Sq, Sk), lambda b: (b, 0, 0)),
        ),
        scratch_shapes=[pltpu.VMEM((Sq, NB), jnp.float32)],
        compiler_params=pltpu.CompilerParams(
            dimension_semantics=("parallel",),
            vmem_limit_bytes=_VMEM_LIMIT,
        ),
    )(q, k, v, rel_k_table, rel_v_table)


# ---------------------------------------------------------------------------
# Parameters & full forward
# ---------------------------------------------------------------------------
def init_params(key, d_model, num_heads, max_pos):
    head_dim = d_model // num_heads
    ks = jax.random.split(key, 6)
    scale_w = 0.1
    # Projection weights stored pre-transposed as (Din, Dout).
    return {
        "q_w": jax.random.normal(ks[0], (d_model, d_model), jnp.float32) * scale_w,
        "q_b": jnp.zeros((d_model,), jnp.float32),
        "k_w": jax.random.normal(ks[1], (d_model, d_model), jnp.float32) * scale_w,
        "k_b": jnp.zeros((d_model,), jnp.float32),
        "v_w": jax.random.normal(ks[2], (d_model, d_model), jnp.float32) * scale_w,
        "v_b": jnp.zeros((d_model,), jnp.float32),
        "o_w": jax.random.normal(ks[3], (d_model, d_model), jnp.float32) * scale_w,
        "o_b": jnp.zeros((d_model,), jnp.float32),
        "rel_k_table": jax.random.normal(ks[4], (2 * max_pos + 1, head_dim), jnp.float32) * scale_w,
        "rel_v_table": jax.random.normal(ks[5], (2 * max_pos + 1, head_dim), jnp.float32) * scale_w,
    }


def shaw_mha_forward(params, query, key, value, num_heads, max_pos):
    """Reproduces Shaw_MultiHeadAttention.forward (mask=None, dropout as identity)."""
    B, Sq, d_model = query.shape
    Sk = key.shape[1]
    head_dim = d_model // num_heads
    inv_scale = 1.0 / math.sqrt(float(head_dim))

    # Fold 1/sqrt(head_dim) into the q projection (weight rescale, not a runtime op
    # on activations); both content and relative score terms then carry the scale.
    q_w = params["q_w"] * inv_scale
    q_b = params["q_b"] * inv_scale

    # Projections emit bf16 — the attention kernel uses bf16 MXU operands anyway,
    # so this halves intermediate HBM traffic without changing the math.
    q = pallas_linear(query, q_w, q_b, out_dtype=jnp.bfloat16)
    k = pallas_linear(key, params["k_w"], params["k_b"], out_dtype=jnp.bfloat16)
    v = pallas_linear(value, params["v_w"], params["v_b"], out_dtype=jnp.bfloat16)

    # (B, S, H, D) -> (B, H, S, D) -> (B*H, S, D)   [index = b*H + h, as in torch]
    def to_bh(x, S):
        x = x.reshape(B, S, num_heads, head_dim).transpose(0, 2, 1, 3)
        return x.reshape(B * num_heads, S, head_dim)

    qh, kh, vh = to_bh(q, Sq), to_bh(k, Sk), to_bh(v, Sk)

    out_bh, attn = pallas_relative_attention(
        qh, kh, vh,
        params["rel_k_table"].astype(jnp.bfloat16),
        params["rel_v_table"].astype(jnp.bfloat16),
        max_pos,
        out_dtype=jnp.bfloat16,
    )

    # Reproduce the original module's view(H, B, S, D) on the (b*H+h)-ordered tensor
    # followed by permute(1, 2, 0, 3) and concat — exact elementwise match to torch.
    out = out_bh.reshape(num_heads, B, Sq, head_dim)
    out = jnp.transpose(out, (1, 2, 0, 3)).reshape(B, Sq, num_heads * head_dim)

    out = pallas_linear(out, params["o_w"], params["o_b"], out_dtype=query.dtype)
    # dropout: identity (eval mode)
    return out, attn


# ---------------------------------------------------------------------------
# Pure-JAX reference (f32, materialized a_key/a_value — matches the torch bmm path)
# ---------------------------------------------------------------------------
def relative_position_table(seq_q, seq_k, emb_table, max_pos):
    rq = jnp.arange(seq_q)
    rk = jnp.arange(seq_k)
    dist = rk[None, :] - rq[:, None]
    idx = jnp.clip(dist, -max_pos, max_pos) + max_pos
    return emb_table[idx]


def reference_forward(params, query, key, value, num_heads, max_pos):
    B, Sq, d_model = query.shape
    Sk = key.shape[1]
    head_dim = d_model // num_heads
    scale = math.sqrt(float(head_dim))

    def lin(x, w_t, b):
        return jnp.einsum("bsd,do->bso", x, w_t) + b

    q = lin(query, params["q_w"], params["q_b"])
    k = lin(key, params["k_w"], params["k_b"])
    v = lin(value, params["v_w"], params["v_b"])

    def to_bh(x, S):
        x = x.reshape(B, S, num_heads, head_dim).transpose(0, 2, 1, 3)
        return x.reshape(B * num_heads, S, head_dim)

    qh, kh, vh = to_bh(q, Sq), to_bh(k, Sk), to_bh(v, Sk)
    a_key = relative_position_table(Sq, Sk, params["rel_k_table"], max_pos)
    a_value = relative_position_table(Sq, Sk, params["rel_v_table"], max_pos)

    qk = jnp.einsum("bid,bjd->bij", qh, kh)
    rel_qk = jnp.einsum("bid,ijd->bij", qh, a_key)
    scores = (qk + rel_qk) / scale
    attn = jax.nn.softmax(scores, axis=-1)
    qkv = jnp.einsum("bij,bjd->bid", attn, vh)
    rel_qkv = jnp.einsum("bij,ijd->bid", attn, a_value)
    out_bh = qkv + rel_qkv

    out = out_bh.reshape(num_heads, B, Sq, head_dim)
    out = jnp.transpose(out, (1, 2, 0, 3)).reshape(B, Sq, num_heads * head_dim)
    out = lin(out, params["o_w"], params["o_b"])
    return out, attn


# ---------------------------------------------------------------------------
if __name__ == "__main__":
    B, S, d_model, num_heads = 2, 8, 32, 4
    max_pos = 8

    key0 = jax.random.PRNGKey(0)
    k_params, k_q, k_k, k_v = jax.random.split(key0, 4)

    params = init_params(k_params, d_model, num_heads, max_pos)
    query = jax.random.normal(k_q, (B, S, d_model), jnp.float32)
    key_in = jax.random.normal(k_k, (B, S, d_model), jnp.float32)
    value = jax.random.normal(k_v, (B, S, d_model), jnp.float32)

    out, attn = shaw_mha_forward(params, query, key_in, value, num_heads, max_pos)
    out = jax.block_until_ready(out)
    attn = jax.block_until_ready(attn)

    out_ref, attn_ref = reference_forward(params, query, key_in, value, num_heads, max_pos)
    # bf16 MXU operands / bf16 intermediates => looser tolerance than the pure-f32 path.
    np.testing.assert_allclose(np.asarray(attn), np.asarray(attn_ref), rtol=2e-2, atol=2e-2)
    np.testing.assert_allclose(np.asarray(out), np.asarray(out_ref), rtol=2e-2, atol=2e-2)

    print("KERNEL_OK")
</pallas_src>

<mosaic_0001>
module attributes {stable_mosaic.version = 11 : i64} {
  func.func @_linear_kernel(%arg0: i32, %arg1: i32, %arg2: memref<16x32xf32, #tpu.memory_space<vmem>>, %arg3: memref<32x32xbf16, #tpu.memory_space<vmem>>, %arg4: memref<1x32xf32, #tpu.memory_space<vmem>>, %arg5: memref<16x32xbf16, #tpu.memory_space<vmem>>) attributes {dimension_semantics = [#tpu.dimension_semantics<parallel>, #tpu.dimension_semantics<parallel>], iteration_bounds = array<i64: 1, 1>, scalar_prefetch = 0 : i64, scratch_operands = 0 : i64, tpu.core_type = #tpu.core_type<tc>, window_params = [{transform_indices = @transform_0, window_bounds = array<i64: 16, 32>}, {transform_indices = @transform_1, window_bounds = array<i64: 32, 32>}, {transform_indices = @transform_2, window_bounds = array<i64: 1, 32>}, {transform_indices = @transform_3, window_bounds = array<i64: 16, 32>}]} {
    %c0 = arith.constant 0 : index
    %c0_0 = arith.constant 0 : index
    %0 = vector.load %arg2[%c0, %c0_0] : memref<16x32xf32, #tpu.memory_space<vmem>>, vector<16x32xf32>
    %1 = arith.truncf %0 : vector<16x32xf32> to vector<16x32xbf16>
    %c0_1 = arith.constant 0 : index
    %c0_2 = arith.constant 0 : index
    %2 = vector.load %arg3[%c0_1, %c0_2] : memref<32x32xbf16, #tpu.memory_space<vmem>>, vector<32x32xbf16>
    %cst = arith.constant dense<0.000000e+00> : vector<16x32xf32>
    %3 = tpu.matmul %1, %2, %cst {dimension_numbers = #tpu.dot_dimension_numbers<[1], [0], [0], [1], [0, 0, 1, 1], [], []>} : vector<16x32xbf16>, vector<32x32xbf16>, vector<16x32xf32> -> vector<16x32xf32>
    %c0_3 = arith.constant 0 : index
    %c0_4 = arith.constant 0 : index
    %4 = vector.load %arg4[%c0_3, %c0_4] : memref<1x32xf32, #tpu.memory_space<vmem>>, vector<1x32xf32>
    %5 = vector.broadcast %4 : vector<1x32xf32> to vector<16x32xf32>
    %6 = arith.addf %3, %5 : vector<16x32xf32>
    %7 = arith.truncf %6 : vector<16x32xf32> to vector<16x32xbf16>
    %c0_5 = arith.constant 0 : index
    %c0_6 = arith.constant 0 : index
    %8 = vector.load %arg5[%c0_5, %c0_6] : memref<16x32xbf16, #tpu.memory_space<vmem>>, vector<16x32xbf16>
    tpu.vector_store %arg5[%c0_5, %c0_6], %7 {strides = array<i32>} : memref<16x32xbf16, #tpu.memory_space<vmem>>, vector<16x32xbf16>,
    return
  }
  func.func @transform_0(%arg0: i32, %arg1: i32) -> (i32, i32) {
    %c0_i32 = arith.constant 0 : i32
    %c0_i32_0 = arith.constant 0 : i32
    return %arg0, %c0_i32 : i32, i32
  }
  func.func @transform_1(%arg0: i32, %arg1: i32) -> (i32, i32) {
    %c0_i32 = arith.constant 0 : i32
    %c0_i32_0 = arith.constant 0 : i32
    return %c0_i32, %arg1 : i32, i32
  }
  func.func @transform_2(%arg0: i32, %arg1: i32) -> (i32, i32) {
    %c0_i32 = arith.constant 0 : i32
    %c0_i32_0 = arith.constant 0 : i32
    return %c0_i32, %arg1 : i32, i32
  }
  func.func @transform_3(%arg0: i32, %arg1: i32) -> (i32, i32) {
    %c0_i32 = arith.constant 0 : i32
    return %arg0, %arg1 : i32, i32
  }
}

</mosaic_0001>

<bundles_post_ra>
// kernel: tpu_custom_call.1
= control target key start
LH: loop header
LB: loop body
LE: loop exit
PB: predicated region body
PF: predicated region fallthrough
CT: control target
= control target key end

     0   :  { %8 = vsyncpa [#allocation3], 0  ;;  %s287_s0 = inlined_call_operand.hbm [shape: f32[16,32], index: 0, kind: input, shape index: {}]   ;;  %s288_s1 = inlined_call_operand.hbm [shape: bf16[32,32], index: 1, kind: input, shape index: {}]   ;;  %s289_s2 = inlined_call_operand.vmem [shape: f32[1,32], index: 2, kind: input, shape index: {}]   ;;  %s290_s3 = inlined_call_operand.hbm [shape: bf16[16,32], index: 3, kind: output, shape index: {}]  }
   0x1   :  { %9 = vsyncpa [#allocation6], 0 }
   0x2   :  { %10 = vsyncpa [#allocation4], 0  ;;  %s240_s12 = smov [#allocation2]  }
   0x3   :  { %s16_s13 = sshll.u32 %s240_s12, 4  ;;  %s17_s13 = int_to_ptr.vmem [resolvable:$true] %s16_s13 }
   0x4   :  { %s182_s14 = scalar_lea.vmem %s17_s13, 256  ;;  %p187_p1 = scmp.lt.s32.totalorder %s17_s13, %s17_s13 }
   0x5   :  { %p183_p0 = scmp.ne.s32.totalorder %s17_s13, %s182_s14  ;;  %p188_p2 = scmp.lt.s32.totalorder %s182_s14, %s182_s14 }
   0x7   :  { %p189_p3 = por %p188_p2, %p187_p1 }
   0x9   :  { %p190_p4 = pnand %p189_p3, %p183_p0 }
   0xb   :  { %193 = shalt.err (!%p190_p4)
}
   0xc   :  { %s241_s15 = smov 128   ;;  %s242_s16 = smov 8  }
   0xd   :  { %22 = dma.hbm_to_vmem [thread:$0]  %s287_s0, 256, %s17_s13, [#allocation3], %s241_s15, %s241_s15, %s242_s16  }
   0xe   :  { %s243_s19 = smov [#allocation5]  }
   0xf   :  { %s28_s20 = sshll.u32 %s243_s19, 4  ;;  %s29_s20 = int_to_ptr.vmem [resolvable:$true] %s28_s20 }
  0x10   :  { %s202_s21 = scalar_lea.vmem %s29_s20, 256  ;;  %p207_p6 = scmp.lt.s32.totalorder %s29_s20, %s29_s20 }
  0x11   :  { %p203_p5 = scmp.ne.s32.totalorder %s29_s20, %s202_s21  ;;  %p208_p7 = scmp.lt.s32.totalorder %s202_s21, %s202_s21 }
  0x13   :  { %p209_p8 = por %p208_p7, %p207_p6 }
  0x15   :  { %p210_p9 = pnand %p209_p8, %p203_p5 }
  0x17   :  { %213 = shalt.err (!%p210_p9)
}
  0x18   :  { %s244_s22 = smov 64   ;;  %s245_s23 = smov 4  }
  0x19   :  { %34 = dma.hbm_to_vmem [thread:$0]  %s288_s1, 256, %s29_s20, [#allocation6], %s244_s22, %s244_s22, %s245_s23  }
  0x1a   :  { %234 = dma.done.wait [#allocation3], 256  }
  0x1b   :  { %235 = vsyncadd [#allocation3], 4294967040 }
  0x1c   :  { %236 = dma.done.wait [#allocation6], 256  }
  0x1d   :  { %237 = vsyncadd [#allocation6], 4294967040  ;;  %v246_v0 = vmov 0.0   ;;  %vm247_vm0 = vmmov 0   ;;  %v172_v1 = vld [vmem:[#allocation5 + $0x8] sm:$0xff]   ;;  %v173_v2 = vld [vmem:[#allocation5] sm:$0xff]  }
  0x1e   :  { %155 = vmatprep.subr.bf16.mxu0 %v246_v0  ;;  %159 = vmatprep.mubr.msk.bf16.mxu0 %vm247_vm0, %v246_v0  ;;  %v44_v3 = vld [vmem:[#allocation2] sm:$0xff]  ;;  %v45_v4 = vld [vmem:[#allocation2 + $0x8] sm:$0xff]  ;;  %vm70_vm1 = vcmask 261120   ;;  %vm123_vm2 = vcmask 257024   ;;  %s248_s26 = smov [#allocation7]  }
  0x1f   :  { %156 = vmatpush3.bf16.msra.mxu0 %v172_v1  ;;  %v46_v5 = vpack.c.bf16 %v45_v4, %v44_v3  ;;  %v144_v6 = vld [vmem:[%s289_s2] ss:$0 sm:$0xff]  ;;  %s131_s27 = sshll.u32 %s248_s26, 4  ;;  %s132_s27 = int_to_ptr.vmem [resolvable:$true] %s131_s27 }
  0x20   :  { %157 = vmatprep.subr.bf16.mxu0 %v246_v0  ;;  %s214_s28 = scalar_lea.vmem %s132_s27, 128  ;;  %p219_p11 = scmp.lt.s32.totalorder %s132_s27, %s132_s27 }
  0x21   :  { %p215_p10 = scmp.ne.s32.totalorder %s132_s27, %s214_s28  ;;  %p220_p12 = scmp.lt.s32.totalorder %s214_s28, %s214_s28 }
  0x23   :  { %158 = vmatpush3.bf16.msra.mxu0 %v173_v2  ;;  %p221_p13 = por %p220_p12, %p219_p11 }
  0x25   :  { %p222_p0 = pnand %p221_p13, %p215_p10 }
  0x26   :  { %160 = vmatmul.mubr.msk.bf16.vlgmr.msra.gmra.mxu0 %vm70_vm1, %v46_v5 }
  0xe6   :  { %v108_v7 = vpop.f32.mrf.mxu0 }
  0xe7   :  { %v109_v8 = vadd.f32 %v144_v6, %v108_v7 }
  0xe8   :  { %v161_v9 = vpop.f32.mrf.mxu0 }
  0xe9   :  { %v150_v10 = vpack.c.bf16 %v109_v8, %v109_v8 }
  0xea   :  { %v111_v11 = vpop.f32.mrf.mxu0 }
  0xeb   :  { %v112_v12 = vadd.f32 %v144_v6, %v111_v11  ;;  %124 = vst.msk [vmem:[#allocation7] sm:$0xf] %vm123_vm2, %v150_v10 }
  0xec   :  { %v162_v13 = vpop.f32.mrf.mxu0 }
  0xed   :  { %v151_v14 = vpack.c.bf16 %v112_v12, %v112_v12 }
  0xef   :  { %125 = vst.msk [vmem:[#allocation7 + $0x4] sm:$0xf] %vm123_vm2, %v151_v14 }
  0xf0   :  { %225 = shalt.err (!%p222_p0)
}
  0xf1   :  { %137 = dma.vmem_to_hbm [thread:$0]  %s132_s27, 128, %s290_s3, [#allocation4], %s244_s22, %s244_s22, %s245_s23  }
  0xf2   :  { %238 = dma.done.wait [#allocation4], 128  }
  0xf3   :  { %239 = vsyncadd [#allocation4], 4294967168 }
  0xf4   :  { %141 = vsyncpa [#allocation3], 1 }
  0xf5   :  { %142 = vsyncpa [#allocation6], 1 }
  0xf6   :  { %143 = vsyncpa [#allocation4], 1 }

</bundles_post_ra>
